<compile_context>
chip_gen: v5e
topology: v5e:2x2
jax: 0.10.0
libtpu: 0.0.40
codegen_flags: <defaults>
</compile_context>

<pallas_src>
import functools

import jax
import jax.numpy as jnp
from jax.experimental import pallas as pl
from jax.experimental.pallas import tpu as pltpu

_LANES = 128

# pi = _PI1 + _PI2 + _PI3 (Cody-Waite split; _PI1 has few mantissa bits so
# k*_PI1 is exact for k up to ~2^16).
_PI1 = 3.140625
_PI2 = 9.67502593994140625e-04
_PI3 = 1.509957990978376432e-07
_INV_PI = 0.31830988618379067154


def _fast_sin_f32(z):
    """sin(z) via Cody-Waite reduction + odd degree-11 polynomial (f32, VPU-only)."""
    k = jnp.floor(z * jnp.float32(_INV_PI) + jnp.float32(0.5))   # round(z/pi)
    r = z - k * jnp.float32(_PI1)
    r = r - k * jnp.float32(_PI2)
    r = r - k * jnp.float32(_PI3)                                 # r in [-pi/2, pi/2]
    s = r * r
    p = jnp.float32(-2.5052108385441718775e-08)                   # -1/11!
    p = p * s + jnp.float32(2.7557319223985890653e-06)            # +1/9!
    p = p * s + jnp.float32(-1.9841269841269841253e-04)           # -1/7!
    p = p * s + jnp.float32(8.3333333333333333333e-03)            # +1/5!
    p = p * s + jnp.float32(-1.6666666666666666667e-01)           # -1/3!
    sin_r = r + r * (s * p)
    k_i = k.astype(jnp.int32)
    sign = jnp.where((k_i & 1) == 0, jnp.float32(1.0), jnp.float32(-1.0))
    return sign * sin_r


def _sine_kernel(x_ref, o_ref, *, w0, use_fast_sin):
    # Elementwise on the whole VMEM tile; compute in f32 internally so bf16/f16
    # inputs keep precision for the w0=30 argument scaling.
    z = jnp.float32(w0) * x_ref[...].astype(jnp.float32)
    y = _fast_sin_f32(z) if use_fast_sin else jnp.sin(z)
    o_ref[...] = y.astype(o_ref.dtype)


def _chip_config():
    """Per-generation (block_bytes, dimension_semantics, vmem_limit_bytes)."""
    kind = ""
    try:
        kind = jax.devices()[0].device_kind.lower()
    except Exception:  # pragma: no cover - defensive, keep conservative default
        pass
    if "v7" in kind or "tpu7" in kind:
        # 2 TCs/chip: shard the grid across cores; bigger blocks, explicit VMEM
        # limit (6 MiB * 2 arrays * 2 buffers = 24 MiB, leave headroom).
        sem = getattr(pltpu, "CORE_PARALLEL", "parallel")
        return 6 * 1024 * 1024, (sem,), 40 * 1024 * 1024
    if "v6" in kind or "trillium" in kind:
        # 4 MiB blocks -> 16 MiB double-buffered, fits the 32 MiB scoped default.
        return 4 * 1024 * 1024, ("parallel",), None
    # v5e / unknown: 16 MiB scoped default -> stay at 2 MiB blocks (8 MiB total).
    return 2 * 1024 * 1024, ("parallel",), None


def sine(x: jax.Array, w0: float = 30.0, *, use_fast_sin: bool = True) -> jax.Array:
    """Applies sin(w0 * x) elementwise via a Pallas TPU kernel."""
    orig_shape = x.shape
    dtype = x.dtype
    n = x.size
    if n == 0:
        return x

    itemsize = jnp.dtype(dtype).itemsize
    # Minimum sublane multiple per dtype packing: f32 -> 8, bf16 -> 16, int8 -> 32.
    sub_mult = max(8, 32 // itemsize)

    block_bytes, dim_sem, vmem_limit = _chip_config()
    cp_kwargs = dict(dimension_semantics=dim_sem)
    if vmem_limit is not None:
        cp_kwargs["vmem_limit_bytes"] = vmem_limit
    compiler_params = pltpu.CompilerParams(**cp_kwargs)

    kernel = functools.partial(_sine_kernel, w0=float(w0), use_fast_sin=use_fast_sin)
    cost = pl.CostEstimate(
        flops=(25 if use_fast_sin else 5) * n,
        transcendentals=0 if use_fast_sin else n,
        bytes_accessed=2 * n * itemsize,
    )

    x_flat = x.reshape(-1)  # row-major flatten: free (bitcast), no HBM copy.

    if n % _LANES == 0:
        # Fast path (typical NCHW activations): lane-dense (rows, 128) slab.
        rows = n // _LANES
        x2d = x_flat.reshape(rows, _LANES)
        target_rows = max(sub_mult, block_bytes // (_LANES * itemsize))
        rows_rounded = -(-rows // sub_mult) * sub_mult
        tile_rows = min(target_rows, rows_rounded)
        grid = (pl.cdiv(rows, tile_rows),)
        out2d = pl.pallas_call(
            kernel,
            out_shape=jax.ShapeDtypeStruct((rows, _LANES), dtype),
            grid_spec=pltpu.PrefetchScalarGridSpec(
                num_scalar_prefetch=0,
                grid=grid,
                in_specs=[pl.BlockSpec((tile_rows, _LANES), lambda i: (i, 0))],
                out_specs=pl.BlockSpec((tile_rows, _LANES), lambda i: (i, 0)),
            ),
            compiler_params=compiler_params,
            cost_estimate=cost,
        )(x2d)
        return out2d.reshape(orig_shape)

    # Misaligned element count: stream the flat array through 1-D blocks.
    # No pad / slice copies; the partial last block covers the tail (OOB reads
    # feed dead lanes, OOB writes are dropped by Pallas).
    granule = sub_mult * _LANES
    target_elems = max(granule, (block_bytes // itemsize) // granule * granule)
    n_rounded = -(-n // granule) * granule
    block_elems = min(target_elems, n_rounded)
    grid = (pl.cdiv(n, block_elems),)
    out1d = pl.pallas_call(
        kernel,
        out_shape=jax.ShapeDtypeStruct((n,), dtype),
        grid_spec=pltpu.PrefetchScalarGridSpec(
            num_scalar_prefetch=0,
            grid=grid,
            in_specs=[pl.BlockSpec((block_elems,), lambda i: (i,))],
            out_specs=pl.BlockSpec((block_elems,), lambda i: (i,)),
        ),
        compiler_params=compiler_params,
        cost_estimate=cost,
    )(x_flat)
    return out1d.reshape(orig_shape)


if __name__ == "__main__":
    w0 = 30.0

    # Small NCHW input consistent with the module's typical use
    # (fast path: element count divisible by 128, zero wrapper copies).
    x = jax.random.normal(jax.random.PRNGKey(0), (2, 4, 16, 16), dtype=jnp.float32)
    y = jax.block_until_ready(sine(x, w0=w0))
    y_ref = jnp.sin(w0 * x)
    assert y.shape == x.shape and y.dtype == x.dtype
    assert jnp.allclose(y, y_ref, atol=1e-5, rtol=1e-5)

    # Awkward-size input (exercises the copy-free 1-D misaligned path).
    x2 = jax.random.normal(jax.random.PRNGKey(1), (3, 5, 7), dtype=jnp.float32)
    y2 = jax.block_until_ready(sine(x2, w0=w0))
    y2_ref = jnp.sin(w0 * x2)
    assert y2.shape == x2.shape and y2.dtype == x2.dtype
    assert jnp.allclose(y2, y2_ref, atol=1e-5, rtol=1e-5)

    # Exact-sin fallback path also works.
    y3 = jax.block_until_ready(sine(x, w0=w0, use_fast_sin=False))
    assert jnp.allclose(y3, y_ref, atol=1e-6, rtol=1e-6)

    print("KERNEL_OK")
</pallas_src>

<mosaic_0001>
module attributes {stable_mosaic.version = 11 : i64} {
  func.func @_sine_kernel(%arg0: i32, %arg1: memref<16x128xf32, #tpu.memory_space<vmem>>, %arg2: memref<16x128xf32, #tpu.memory_space<vmem>>) attributes {dimension_semantics = [#tpu.dimension_semantics<parallel>], iteration_bounds = array<i64: 1>, scalar_prefetch = 0 : i64, scratch_operands = 0 : i64, tpu.core_type = #tpu.core_type<tc>, window_params = [{transform_indices = @transform_0, window_bounds = array<i64: 16, 128>}, {transform_indices = @transform_1, window_bounds = array<i64: 16, 128>}]} {
    %c0 = arith.constant 0 : index
    %c0_0 = arith.constant 0 : index
    %0 = vector.load %arg1[%c0, %c0_0] : memref<16x128xf32, #tpu.memory_space<vmem>>, vector<16x128xf32>
    %cst = arith.constant 3.000000e+01 : f32
    %1 = vector.broadcast %cst : f32 to vector<16x128xf32>
    %2 = arith.mulf %1, %0 : vector<16x128xf32>
    %cst_1 = arith.constant 0.318309873 : f32
    %3 = vector.broadcast %cst_1 : f32 to vector<16x128xf32>
    %4 = arith.mulf %2, %3 : vector<16x128xf32>
    %cst_2 = arith.constant 5.000000e-01 : f32
    %5 = vector.broadcast %cst_2 : f32 to vector<16x128xf32>
    %6 = arith.addf %4, %5 : vector<16x128xf32>
    %7 = math.floor %6 : vector<16x128xf32>
    %cst_3 = arith.constant 3.140625 : f32
    %8 = vector.broadcast %cst_3 : f32 to vector<16x128xf32>
    %9 = arith.mulf %7, %8 : vector<16x128xf32>
    %10 = arith.subf %2, %9 : vector<16x128xf32>
    %cst_4 = arith.constant 9.67502593E-4 : f32
    %11 = vector.broadcast %cst_4 : f32 to vector<16x128xf32>
    %12 = arith.mulf %7, %11 : vector<16x128xf32>
    %13 = arith.subf %10, %12 : vector<16x128xf32>
    %cst_5 = arith.constant 1.50995803E-7 : f32
    %14 = vector.broadcast %cst_5 : f32 to vector<16x128xf32>
    %15 = arith.mulf %7, %14 : vector<16x128xf32>
    %16 = arith.subf %13, %15 : vector<16x128xf32>
    %17 = arith.mulf %16, %16 : vector<16x128xf32>
    %cst_6 = arith.constant -2.50521079E-8 : f32
    %18 = vector.broadcast %cst_6 : f32 to vector<16x128xf32>
    %19 = arith.mulf %18, %17 : vector<16x128xf32>
    %cst_7 = arith.constant 2.75573188E-6 : f32
    %20 = vector.broadcast %cst_7 : f32 to vector<16x128xf32>
    %21 = arith.addf %19, %20 : vector<16x128xf32>
    %22 = arith.mulf %21, %17 : vector<16x128xf32>
    %cst_8 = arith.constant -1.98412701E-4 : f32
    %23 = vector.broadcast %cst_8 : f32 to vector<16x128xf32>
    %24 = arith.addf %22, %23 : vector<16x128xf32>
    %25 = arith.mulf %24, %17 : vector<16x128xf32>
    %cst_9 = arith.constant 0.00833333377 : f32
    %26 = vector.broadcast %cst_9 : f32 to vector<16x128xf32>
    %27 = arith.addf %25, %26 : vector<16x128xf32>
    %28 = arith.mulf %27, %17 : vector<16x128xf32>
    %cst_10 = arith.constant -0.166666672 : f32
    %29 = vector.broadcast %cst_10 : f32 to vector<16x128xf32>
    %30 = arith.addf %28, %29 : vector<16x128xf32>
    %31 = arith.mulf %17, %30 : vector<16x128xf32>
    %32 = arith.mulf %16, %31 : vector<16x128xf32>
    %33 = arith.addf %16, %32 : vector<16x128xf32>
    %34 = arith.fptosi %7 : vector<16x128xf32> to vector<16x128xi32>
    %c1_i32 = arith.constant 1 : i32
    %35 = vector.broadcast %c1_i32 : i32 to vector<16x128xi32>
    %36 = arith.andi %34, %35 : vector<16x128xi32>
    %c0_i32 = arith.constant 0 : i32
    %37 = vector.broadcast %c0_i32 : i32 to vector<16x128xi32>
    %38 = arith.cmpi eq, %36, %37 : vector<16x128xi32>
    %cst_11 = arith.constant 1.000000e+00 : f32
    %cst_12 = arith.constant -1.000000e+00 : f32
    %39 = vector.broadcast %cst_11 : f32 to vector<16x128xf32>
    %40 = vector.broadcast %cst_12 : f32 to vector<16x128xf32>
    %41 = arith.select %38, %39, %40 : vector<16x128xi1>, vector<16x128xf32>
    %42 = arith.mulf %41, %33 : vector<16x128xf32>
    %c0_13 = arith.constant 0 : index
    %c0_14 = arith.constant 0 : index
    %43 = vector.load %arg2[%c0_13, %c0_14] : memref<16x128xf32, #tpu.memory_space<vmem>>, vector<16x128xf32>
    tpu.vector_store %arg2[%c0_13, %c0_14], %42 {strides = array<i32>} : memref<16x128xf32, #tpu.memory_space<vmem>>, vector<16x128xf32>,
    return
  }
  func.func @transform_0(%arg0: i32) -> (i32, i32) {
    %c0_i32 = arith.constant 0 : i32
    %c0_i32_0 = arith.constant 0 : i32
    return %arg0, %c0_i32 : i32, i32
  }
  func.func @transform_1(%arg0: i32) -> (i32, i32) {
    %c0_i32 = arith.constant 0 : i32
    %c0_i32_0 = arith.constant 0 : i32
    return %arg0, %c0_i32 : i32, i32
  }
}

</mosaic_0001>

<bundles_post_ra>
// kernel: tpu_custom_call.1
= control target key start
LH: loop header
LB: loop body
LE: loop exit
PB: predicated region body
PF: predicated region fallthrough
CT: control target
= control target key end

     0   :  { %6 = vsyncpa [#allocation3], 0  ;;  %s190_s0 = inlined_call_operand.hbm [shape: f32[16,128], index: 0, kind: input, shape index: {}]   ;;  %s191_s1 = inlined_call_operand.hbm [shape: f32[16,128], index: 1, kind: output, shape index: {}]  }
   0x1   :  { %7 = vsyncpa [#allocation4], 0  ;;  %s12_s8 = sshll.u32 %s190_s0, 4  ;;  %s163_s9 = smov [#allocation2]   ;;  %s13_s8 = int_to_ptr.hbm [resolvable:$true] %s12_s8 }
   0x2   :  { %s14_s10 = sshll.u32 %s163_s9, 4  ;;  %s164_s11 = smov 128   ;;  %s15_s10 = int_to_ptr.vmem [resolvable:$true] %s14_s10 }
   0x3   :  { %s165_s12 = smov 8  }
   0x4   :  { %20 = dma.hbm_to_vmem [thread:$0]  %s13_s8, 256, %s15_s10, [#allocation3], %s164_s11, %s164_s11, %s165_s12  }
   0x5   :  { %159 = dma.done.wait [#allocation3], 256  }
   0x6   :  { %160 = vsyncadd [#allocation3], 4294967040  ;;  %v25_v0 = vld [vmem:[#allocation2] sm:$0xff]  ;;  %v26_v1 = vld [vmem:[#allocation2 + $0x8] sm:$0xff]  ;;  %v166_v47 = vmov -1.0   ;;  %s167_s0 = smov [#allocation5]  }
   0x7   :  { %v27_v2 = vmul.f32 30.0, %v25_v0  ;;  %v28_v3 = vmul.f32 30.0, %v26_v1  ;;  %s87_s13 = sshll.u32 %s167_s0, 4  ;;  %s89_s16 = sshll.u32 %s191_s1, 4  ;;  %s88_s13 = int_to_ptr.vmem [resolvable:$true] %s87_s13  ;;  %s90_s16 = int_to_ptr.hbm [resolvable:$true] %s89_s16 }
   0x9   :  { %v29_v4 = vmul.f32 0.31830987, %v27_v2  ;;  %v30_v5 = vmul.f32 0.31830987, %v28_v3 }
   0xb   :  { %v31_v6 = vadd.f32 0.5, %v29_v4  ;;  %v32_v7 = vadd.f32 0.5, %v30_v5 }
   0xd   :  { %v33_v8 = vfloor.f32 %v31_v6  ;;  %v34_v9 = vfloor.f32 %v32_v7 }
   0xf   :  { %v35_v10 = vmul.f32 3.140625, %v33_v8  ;;  %v39_v11 = vmul.f32 0.0009675026, %v33_v8  ;;  %v36_v12 = vmul.f32 3.140625, %v34_v9  ;;  %v40_v13 = vmul.f32 0.0009675026, %v34_v9 }
  0x10   :  { %v43_v15 = vmul.f32 1.509958e-07, %v33_v8  ;;  %v44_v17 = vmul.f32 1.509958e-07, %v34_v9  ;;  %v103_v33 = vcvt.f32.s32 %v33_v8  ;;  %v105_v35 = vcvt.f32.s32 %v34_v9 }
  0x11   :  { %v37_v14 = vsub.f32 %v27_v2, %v35_v10  ;;  %v38_v16 = vsub.f32 %v28_v3, %v36_v12 }
  0x12   :  { %v73_v39 = vand.u32 1, %v103_v33  ;;  %v74_v41 = vand.u32 1, %v105_v35 }
  0x13   :  { %v41_v18 = vsub.f32 %v37_v14, %v39_v11  ;;  %v42_v19 = vsub.f32 %v38_v16, %v40_v13 }
  0x14   :  { %vm75_vm0 = vcmp.eq.s32.totalorder %v73_v39, 0  ;;  %vm76_vm1 = vcmp.eq.s32.totalorder %v74_v41, 0 }
  0x15   :  { %v45_v20 = vsub.f32 %v41_v18, %v43_v15  ;;  %v46_v21 = vsub.f32 %v42_v19, %v44_v17  ;;  %v77_v48 = vsel %vm75_vm0, 1.0, %v166_v47  ;;  %v78_v51 = vsel %vm76_vm1, 1.0, %v166_v47 }
  0x17   :  { %v47_v22 = vmul.f32 %v45_v20, %v45_v20  ;;  %v48_v23 = vmul.f32 %v46_v21, %v46_v21 }
  0x19   :  { %v49_v24 = vmul.f32 -2.5052108e-08, %v47_v22  ;;  %v50_v25 = vmul.f32 -2.5052108e-08, %v48_v23 }
  0x1b   :  { %v51_v26 = vadd.f32 2.7557319e-06, %v49_v24  ;;  %v52_v27 = vadd.f32 2.7557319e-06, %v50_v25 }
  0x1d   :  { %v53_v28 = vmul.f32 %v51_v26, %v47_v22  ;;  %v54_v29 = vmul.f32 %v52_v27, %v48_v23 }
  0x1f   :  { %v55_v30 = vadd.f32 -0.0001984127, %v53_v28  ;;  %v56_v31 = vadd.f32 -0.0001984127, %v54_v29 }
  0x21   :  { %v57_v32 = vmul.f32 %v55_v30, %v47_v22  ;;  %v58_v34 = vmul.f32 %v56_v31, %v48_v23 }
  0x23   :  { %v59_v36 = vadd.f32 0.008333334, %v57_v32  ;;  %v60_v37 = vadd.f32 0.008333334, %v58_v34 }
  0x25   :  { %v61_v38 = vmul.f32 %v59_v36, %v47_v22  ;;  %v62_v40 = vmul.f32 %v60_v37, %v48_v23 }
  0x27   :  { %v63_v42 = vadd.f32 -0.16666667, %v61_v38  ;;  %v64_v43 = vadd.f32 -0.16666667, %v62_v40 }
  0x29   :  { %v65_v44 = vmul.f32 %v63_v42, %v47_v22  ;;  %v66_v45 = vmul.f32 %v64_v43, %v48_v23 }
  0x2b   :  { %v67_v46 = vmul.f32 %v65_v44, %v45_v20  ;;  %v68_v49 = vmul.f32 %v66_v45, %v46_v21 }
  0x2d   :  { %v69_v50 = vadd.f32 %v67_v46, %v45_v20  ;;  %v70_v52 = vadd.f32 %v68_v49, %v46_v21 }
  0x2f   :  { %v79_v53 = vmul.f32 %v77_v48, %v69_v50  ;;  %v80_v54 = vmul.f32 %v78_v51, %v70_v52 }
  0x31   :  { %81 = vst [vmem:[#allocation5] sm:$0xff] %v79_v53 }
  0x32   :  { %82 = vst [vmem:[#allocation5 + $0x8] sm:$0xff] %v80_v54 }
  0x33   :  { %95 = dma.vmem_to_hbm [thread:$0]  %s88_s13, 256, %s90_s16, [#allocation4], %s164_s11, %s164_s11, %s165_s12  }
  0x34   :  { %161 = dma.done.wait [#allocation4], 256  }
  0x35   :  { %162 = vsyncadd [#allocation4], 4294967040 }
  0x36   :  { %100 = vsyncpa [#allocation3], 1 }
  0x37   :  { %101 = vsyncpa [#allocation4], 1 }

</bundles_post_ra>
